<compile_context>
chip_gen: v7x
topology: tpu7x:2x2x1
jax: 0.10.0
libtpu: 0.0.40
codegen_flags: <defaults>
</compile_context>

<pallas_src>
import jax
import jax.numpy as jnp
from jax.experimental import pallas as pl
from jax.experimental.pallas import tpu as pltpu


def _insurance_net_kernel(x_ref, w1_ref, b1_ref, w2_ref, b2_ref, out_ref):
    # x: [TB, 23], w1: [23, 15], b1: [1, 15], w2: [15, 2], b2: [1, 2]
    x = x_ref[...]
    # fc1 + ReLU (MXU matmul, f32 accumulation)
    h = jnp.dot(x, w1_ref[...], preferred_element_type=jnp.float32) + b1_ref[...]
    h = jnp.maximum(h, 0.0)
    # fc2 (no activation)
    y = jnp.dot(h, w2_ref[...], preferred_element_type=jnp.float32) + b2_ref[...]
    out_ref[...] = y.astype(out_ref.dtype)


def insurance_net_forward(x, kparams, *, block_b=2048):
    """x: [B, 23] float32, kparams in kernel layout (see prepare_params) -> [B, 2]."""
    w1, b1, w2, b2 = kparams["w1"], kparams["b1"], kparams["w2"], kparams["b2"]
    B, f_in = x.shape
    f_hid = w1.shape[1]
    f_out = w2.shape[1]

    # Batch tile: if B fits in one block, use the full dim (always a legal block
    # shape); otherwise use block_b (a multiple of 8) and let Pallas handle the
    # partial last block.
    tb = B if B <= block_b else block_b
    grid = (pl.cdiv(B, tb),)

    cost = pl.CostEstimate(
        flops=2 * B * (f_in * f_hid + f_hid * f_out),
        transcendentals=0,
        bytes_accessed=(
            B * (f_in + f_out) * 4
            + (f_in * f_hid + f_hid + f_hid * f_out + f_out) * 4
        ),
    )

    return pl.pallas_call(
        _insurance_net_kernel,
        out_shape=jax.ShapeDtypeStruct((B, f_out), jnp.float32),
        grid=grid,
        in_specs=[
            pl.BlockSpec((tb, f_in), lambda i: (i, 0)),      # x: tiled over batch
            pl.BlockSpec((f_in, f_hid), lambda i: (0, 0)),   # w1: VMEM-resident
            pl.BlockSpec((1, f_hid), lambda i: (0, 0)),      # b1
            pl.BlockSpec((f_hid, f_out), lambda i: (0, 0)),  # w2
            pl.BlockSpec((1, f_out), lambda i: (0, 0)),      # b2
        ],
        out_specs=pl.BlockSpec((tb, f_out), lambda i: (i, 0)),
        compiler_params=pltpu.CompilerParams(
            dimension_semantics=("parallel",),
        ),
        cost_estimate=cost,
    )(x, w1, b1, w2, b2)


def init_params(key):
    """PyTorch nn.Linear default init (U[-1/sqrt(in), 1/sqrt(in)]), PyTorch layout."""
    k1, k2, k3, k4 = jax.random.split(key, 4)
    bound1 = 1.0 / jnp.sqrt(23.0)
    bound2 = 1.0 / jnp.sqrt(15.0)
    return {
        "w1": jax.random.uniform(k1, (15, 23), jnp.float32, -bound1, bound1),
        "b1": jax.random.uniform(k2, (15,), jnp.float32, -bound1, bound1),
        "w2": jax.random.uniform(k3, (2, 15), jnp.float32, -bound2, bound2),
        "b2": jax.random.uniform(k4, (2,), jnp.float32, -bound2, bound2),
    }


def prepare_params(params):
    """One-time conversion from PyTorch (out, in)/[out] layout to kernel layout."""
    return {
        "w1": jnp.asarray(params["w1"]).T,                # [23, 15]
        "b1": jnp.asarray(params["b1"]).reshape(1, -1),   # [1, 15]
        "w2": jnp.asarray(params["w2"]).T,                # [15, 2]
        "b2": jnp.asarray(params["b2"]).reshape(1, -1),   # [1, 2]
    }


def reference_forward(x, params):
    h = jnp.maximum(x @ params["w1"].T + params["b1"], 0.0)
    return h @ params["w2"].T + params["b2"]


if __name__ == "__main__":
    key = jax.random.PRNGKey(0)
    pkey, xkey = jax.random.split(key)
    params = init_params(pkey)
    kparams = prepare_params(params)   # weight layout conversion done once

    B = 64
    x = jax.random.normal(xkey, (B, 23), jnp.float32)
    ref = reference_forward(x, params)

    # Single-block path (B fits in one batch tile).
    out = jax.block_until_ready(insurance_net_forward(x, kparams))
    assert out.shape == (B, 2)
    assert jnp.allclose(out, ref, atol=1e-5, rtol=1e-5), "mismatch vs reference"

    # Multi-step grid path (exercises batch tiling / double-buffered pipelining).
    out_tiled = jax.block_until_ready(insurance_net_forward(x, kparams, block_b=16))
    assert jnp.allclose(out_tiled, ref, atol=1e-5, rtol=1e-5), "tiled mismatch vs reference"

    print("KERNEL_OK")
</pallas_src>

<mosaic_0001>
module attributes {stable_mosaic.version = 11 : i64} {
  func.func @_insurance_net_kernel(%arg0: i32, %arg1: memref<64x23xf32, #tpu.memory_space<vmem>>, %arg2: memref<23x15xf32, #tpu.memory_space<vmem>>, %arg3: memref<1x15xf32, #tpu.memory_space<vmem>>, %arg4: memref<15x2xf32, #tpu.memory_space<vmem>>, %arg5: memref<1x2xf32, #tpu.memory_space<vmem>>, %arg6: memref<64x2xf32, #tpu.memory_space<vmem>>) attributes {dimension_semantics = [#tpu.dimension_semantics<parallel>], iteration_bounds = array<i64: 1>, scalar_prefetch = 0 : i64, scratch_operands = 0 : i64, tpu.core_type = #tpu.core_type<tc>, window_params = [{transform_indices = @transform_0, window_bounds = array<i64: 64, 23>}, {pipeline_mode = #tpu.pipeline_mode<synchronous>, transform_indices = @transform_1, window_bounds = array<i64: 23, 15>}, {pipeline_mode = #tpu.pipeline_mode<synchronous>, transform_indices = @transform_2, window_bounds = array<i64: 1, 15>}, {pipeline_mode = #tpu.pipeline_mode<synchronous>, transform_indices = @transform_3, window_bounds = array<i64: 15, 2>}, {pipeline_mode = #tpu.pipeline_mode<synchronous>, transform_indices = @transform_4, window_bounds = array<i64: 1, 2>}, {transform_indices = @transform_5, window_bounds = array<i64: 64, 2>}]} {
    %c0 = arith.constant 0 : index
    %c0_0 = arith.constant 0 : index
    %0 = vector.load %arg1[%c0, %c0_0] : memref<64x23xf32, #tpu.memory_space<vmem>>, vector<64x23xf32>
    %c0_1 = arith.constant 0 : index
    %c0_2 = arith.constant 0 : index
    %1 = vector.load %arg2[%c0_1, %c0_2] : memref<23x15xf32, #tpu.memory_space<vmem>>, vector<23x15xf32>
    %cst = arith.constant dense<0.000000e+00> : vector<64x15xf32>
    %2 = tpu.matmul %0, %1, %cst {dimension_numbers = #tpu.dot_dimension_numbers<[1], [0], [0], [1], [0, 0, 1, 1], [], []>} : vector<64x23xf32>, vector<23x15xf32>, vector<64x15xf32> -> vector<64x15xf32>
    %c0_3 = arith.constant 0 : index
    %c0_4 = arith.constant 0 : index
    %3 = vector.load %arg3[%c0_3, %c0_4] : memref<1x15xf32, #tpu.memory_space<vmem>>, vector<1x15xf32>
    %4 = vector.broadcast %3 : vector<1x15xf32> to vector<64x15xf32>
    %5 = arith.addf %2, %4 : vector<64x15xf32>
    %cst_5 = arith.constant 0.000000e+00 : f32
    %6 = vector.broadcast %cst_5 : f32 to vector<64x15xf32>
    %7 = arith.maximumf %5, %6 : vector<64x15xf32>
    %c0_6 = arith.constant 0 : index
    %c0_7 = arith.constant 0 : index
    %8 = vector.load %arg4[%c0_6, %c0_7] : memref<15x2xf32, #tpu.memory_space<vmem>>, vector<15x2xf32>
    %cst_8 = arith.constant dense<0.000000e+00> : vector<64x2xf32>
    %9 = tpu.matmul %7, %8, %cst_8 {dimension_numbers = #tpu.dot_dimension_numbers<[1], [0], [0], [1], [0, 0, 1, 1], [], []>} : vector<64x15xf32>, vector<15x2xf32>, vector<64x2xf32> -> vector<64x2xf32>
    %c0_9 = arith.constant 0 : index
    %c0_10 = arith.constant 0 : index
    %10 = vector.load %arg5[%c0_9, %c0_10] : memref<1x2xf32, #tpu.memory_space<vmem>>, vector<1x2xf32>
    %11 = vector.broadcast %10 : vector<1x2xf32> to vector<64x2xf32>
    %12 = arith.addf %9, %11 : vector<64x2xf32>
    %c0_11 = arith.constant 0 : index
    %c0_12 = arith.constant 0 : index
    %13 = vector.load %arg6[%c0_11, %c0_12] : memref<64x2xf32, #tpu.memory_space<vmem>>, vector<64x2xf32>
    tpu.vector_store %arg6[%c0_11, %c0_12], %12 {strides = array<i32>} : memref<64x2xf32, #tpu.memory_space<vmem>>, vector<64x2xf32>,
    return
  }
  func.func @transform_0(%arg0: i32) -> (i32, i32) {
    %c0_i32 = arith.constant 0 : i32
    %c0_i32_0 = arith.constant 0 : i32
    return %arg0, %c0_i32 : i32, i32
  }
  func.func @transform_1(%arg0: i32) -> (i32, i32) {
    %c0_i32 = arith.constant 0 : i32
    %c0_i32_0 = arith.constant 0 : i32
    %c0_i32_1 = arith.constant 0 : i32
    return %c0_i32, %c0_i32_0 : i32, i32
  }
  func.func @transform_2(%arg0: i32) -> (i32, i32) {
    %c0_i32 = arith.constant 0 : i32
    %c0_i32_0 = arith.constant 0 : i32
    %c0_i32_1 = arith.constant 0 : i32
    return %c0_i32, %c0_i32_0 : i32, i32
  }
  func.func @transform_3(%arg0: i32) -> (i32, i32) {
    %c0_i32 = arith.constant 0 : i32
    %c0_i32_0 = arith.constant 0 : i32
    %c0_i32_1 = arith.constant 0 : i32
    return %c0_i32, %c0_i32_0 : i32, i32
  }
  func.func @transform_4(%arg0: i32) -> (i32, i32) {
    %c0_i32 = arith.constant 0 : i32
    %c0_i32_0 = arith.constant 0 : i32
    %c0_i32_1 = arith.constant 0 : i32
    return %c0_i32, %c0_i32_0 : i32, i32
  }
  func.func @transform_5(%arg0: i32) -> (i32, i32) {
    %c0_i32 = arith.constant 0 : i32
    %c0_i32_0 = arith.constant 0 : i32
    return %arg0, %c0_i32 : i32, i32
  }
}

</mosaic_0001>

<bundles_post_ra>
// kernel: tpu_custom_call.1
= control target key start
LH: loop header
LB: loop body
LE: loop exit
PB: predicated region body
PF: predicated region fallthrough
CT: control target
= control target key end

     0   :  { %vm38_vm0 = vcmask 187392   ;;  %vm63_vm1 = vcmask 1046528   ;;  %vm421_vm2 = vmmov 1   ;;  %vm189_vm4 = vcmask 121856   ;;  %s548_s1 = inlined_call_operand.vmem [shape: f32[23,15], index: 1, kind: input, shape index: {}]   ;;  %s549_s0 = inlined_call_operand.vmem [shape: f32[64,23], index: 0, kind: input, shape index: {}]   ;;  %s550_s3 = inlined_call_operand.vmem [shape: f32[15,2], index: 3, kind: input, shape index: {}]   ;;  %s551_s2 = inlined_call_operand.vmem [shape: f32[1,15], index: 2, kind: input, shape index: {}]   ;;  %s552_s4 = inlined_call_operand.vmem [shape: f32[1,2], index: 4, kind: input, shape index: {}]   ;;  %s553_s5 = inlined_call_operand.vmem [shape: f32[64,2], index: 5, kind: output, shape index: {}]  }
   0x1   :  { %v28_v0 = vld [vmem:[%s548_s1] sm:$0xff]  ;;  %v29_v1 = vld [vmem:[%s548_s1 + $0x8] sm:$0xff]  ;;  %v30_v4 = vld [vmem:[%s548_s1 + $0x10] sm:$0x7f]  ;;  %vm322_vm5 = vcmask 15360  }
   0x2   :  { %v410_v2 = vpack.c.bf16 %v29_v1, %v28_v0  ;;  %v20_v3 = vld [vmem:[%s549_s0] sm:$0xff]  ;;  %v21_v5 = vld [vmem:[%s549_s0 + $0x8] sm:$0xff]  ;;  %v22_v6 = vld [vmem:[%s549_s0 + $0x10] sm:$0xff] }
   0x3   :  { %382 = vmatprep.mubr.msk.f32.mxu0 %vm38_vm0, %v20_v3  ;;  %v23_v7 = vld [vmem:[%s549_s0 + $0x18] sm:$0xff]  ;;  %v24_v8 = vld [vmem:[%s549_s0 + $0x20] sm:$0xff]  ;;  %v25_v9 = vld [vmem:[%s549_s0 + $0x28] sm:$0xff] }
   0x4   :  { %411 = vmatprep.subr.bf16.mxu0 %v410_v2  ;;  %v26_v10 = vld [vmem:[%s549_s0 + $0x30] sm:$0xff]  ;;  %v27_v11 = vld [vmem:[%s549_s0 + $0x38] sm:$0xff]  ;;  %v180_v12 = vld [vmem:[%s550_s3] sm:$0xff] }
   0x5   :  { %413 = vmatpush3.bf16.msra.mxu0 %v410_v2  ;;  %v181_v13 = vld [vmem:[%s550_s3 + $0x8] sm:$0x7f]  ;;  %vm415_vm3 = vmpackc.low %vm63_vm1, %vm421_vm2  ;;  %v335_v15 = vld [vmem:[%s551_s2] ss:$0 sm:$0xff] }
   0x6   :  { %380 = vmatprep.subr.msk.mxu0 %vm63_vm1, %v30_v4  ;;  %v414_v14 = vpack.c.bf16 %v181_v13, %v180_v12  ;;  %v345_v40 = vld [vmem:[%s552_s4] ss:$0 sm:$0xff] }
   0x8   :  { %416 = vmatprep.subr.msk.bf16.mxu1 %vm415_vm3, %v414_v14 }
   0x9   :  { %381 = vmatpush3.msk.msra.mxu0 %vm63_vm1, %v30_v4  ;;  %419 = vmatpush3.bf16.msk.msra.mxu1 %vm415_vm3, %v414_v14 }
   0xa   :  { %383 = vmatmul.mubr.msk.f32.vlgmr.msra.gmra.mrb[0].mxu0 %vm38_vm0, %v21_v5 }
   0xb   :  { %385 = vmatprep.mubr.msk.f32.mxu0 %vm38_vm0, %v22_v6 }
   0xe   :  { %386 = vmatmul.mubr.msk.f32.gmra.mrb[2].mxu0 %vm38_vm0, %v23_v7 }
   0xf   :  { %388 = vmatprep.mubr.msk.f32.mxu0 %vm38_vm0, %v24_v8 }
  0x12   :  { %389 = vmatmul.mubr.msk.f32.gmra.mrb[4].mxu0 %vm38_vm0, %v25_v9 }
  0x13   :  { %391 = vmatprep.mubr.msk.f32.mxu0 %vm38_vm0, %v26_v10 }
  0x16   :  { %392 = vmatmul.mubr.msk.f32.gmra.mrb[6].mxu0 %vm38_vm0, %v27_v11 }
  0xdd   :  { %v384_v16 = vpop.f32.mrb[0].mxu0 }
  0xde   :  { %v139_v17 = vadd.f32 %v384_v16, %v335_v15  ;;  %v133_v18 = vpop.f32.mrb[1].mxu0 }
  0xdf   :  { %v134_v19 = vadd.f32 %v335_v15, %v133_v18 }
  0xe0   :  { %v173_v22 = vmax.f32 %v139_v17, 0.0 }
  0xe1   :  { %v172_v20 = vmax.f32 %v134_v19, 0.0  ;;  %v387_v21 = vpop.f32.mrb[2].mxu0 }
  0xe2   :  { %v149_v23 = vadd.f32 %v387_v21, %v335_v15  ;;  %v143_v24 = vpop.f32.mrb[3].mxu0 }
  0xe3   :  { %v144_v25 = vadd.f32 %v335_v15, %v143_v24  ;;  %398 = vmatprep.mubr.msk.f32.mxu1 %vm189_vm4, %v172_v20 }
  0xe4   :  { %399 = vmatmul.mubr.msk.f32.vlgmr.msra.gmra.mrb[0].mxu1 %vm189_vm4, %v173_v22  ;;  %v175_v28 = vmax.f32 %v149_v23, 0.0 }
  0xe5   :  { %v174_v26 = vmax.f32 %v144_v25, 0.0  ;;  %v390_v27 = vpop.f32.mrb[4].mxu0 }
  0xe6   :  { %v159_v29 = vadd.f32 %v390_v27, %v335_v15  ;;  %v153_v30 = vpop.f32.mrb[5].mxu0 }
  0xe7   :  { %v154_v31 = vadd.f32 %v335_v15, %v153_v30  ;;  %401 = vmatprep.mubr.msk.f32.mxu1 %vm189_vm4, %v174_v26 }
  0xe8   :  { %402 = vmatmul.mubr.msk.f32.gmra.mrb[2].mxu1 %vm189_vm4, %v175_v28  ;;  %v177_v34 = vmax.f32 %v159_v29, 0.0 }
  0xe9   :  { %v176_v32 = vmax.f32 %v154_v31, 0.0  ;;  %v393_v33 = vpop.f32.mrb[6].mxu0 }
  0xea   :  { %v169_v35 = vadd.f32 %v393_v33, %v335_v15  ;;  %v163_v36 = vpop.f32.mrb[7].mxu0 }
  0xeb   :  { %v164_v37 = vadd.f32 %v335_v15, %v163_v36  ;;  %404 = vmatprep.mubr.msk.f32.mxu1 %vm189_vm4, %v176_v32 }
  0xec   :  { %405 = vmatmul.mubr.msk.f32.gmra.mrb[4].mxu1 %vm189_vm4, %v177_v34  ;;  %v179_v39 = vmax.f32 %v169_v35, 0.0 }
  0xed   :  { %v178_v38 = vmax.f32 %v164_v37, 0.0 }
  0xef   :  { %407 = vmatprep.mubr.msk.f32.mxu1 %vm189_vm4, %v178_v38 }
  0xf0   :  { %408 = vmatmul.mubr.msk.f32.gmra.mrb[6].mxu1 %vm189_vm4, %v179_v39 }
 0x1b7   :  { %v400_v41 = vpop.f32.mrb[0].mxu1 }
 0x1b8   :  { %v289_v42 = vadd.f32 %v400_v41, %v345_v40  ;;  %v283_v43 = vpop.f32.mrb[1].mxu1 }
 0x1b9   :  { %v284_v44 = vadd.f32 %v345_v40, %v283_v43 }
 0x1ba   :  { %324 = vst.msk [vmem:[%s553_s5 + $0x8] sm:$0xff] %vm322_vm5, %v289_v42 }
 0x1bb   :  { %323 = vst.msk [vmem:[%s553_s5] sm:$0xff] %vm322_vm5, %v284_v44  ;;  %v403_v45 = vpop.f32.mrb[2].mxu1 }
 0x1bc   :  { %v299_v46 = vadd.f32 %v403_v45, %v345_v40  ;;  %v293_v47 = vpop.f32.mrb[3].mxu1 }
 0x1bd   :  { %v294_v48 = vadd.f32 %v345_v40, %v293_v47 }
 0x1be   :  { %326 = vst.msk [vmem:[%s553_s5 + $0x18] sm:$0xff] %vm322_vm5, %v299_v46 }
 0x1bf   :  { %325 = vst.msk [vmem:[%s553_s5 + $0x10] sm:$0xff] %vm322_vm5, %v294_v48  ;;  %v406_v49 = vpop.f32.mrb[4].mxu1 }
 0x1c0   :  { %v309_v50 = vadd.f32 %v406_v49, %v345_v40  ;;  %v303_v51 = vpop.f32.mrb[5].mxu1 }
 0x1c1   :  { %v304_v52 = vadd.f32 %v345_v40, %v303_v51 }
 0x1c2   :  { %328 = vst.msk [vmem:[%s553_s5 + $0x28] sm:$0xff] %vm322_vm5, %v309_v50 }
 0x1c3   :  { %327 = vst.msk [vmem:[%s553_s5 + $0x20] sm:$0xff] %vm322_vm5, %v304_v52  ;;  %v409_v53 = vpop.f32.mrb[6].mxu1 }
 0x1c4   :  { %v319_v54 = vadd.f32 %v409_v53, %v345_v40  ;;  %v313_v55 = vpop.f32.mrb[7].mxu1 }
 0x1c5   :  { %v314_v56 = vadd.f32 %v345_v40, %v313_v55 }
 0x1c6   :  { %330 = vst.msk [vmem:[%s553_s5 + $0x38] sm:$0xff] %vm322_vm5, %v319_v54 }
 0x1c7   :  { %329 = vst.msk [vmem:[%s553_s5 + $0x30] sm:$0xff] %vm322_vm5, %v314_v56 }

</bundles_post_ra>
